<compile_context>
chip_gen: v7x
topology: tpu7x:2x2x1
jax: 0.10.0
libtpu: 0.0.40
codegen_flags: <defaults>
</compile_context>

<pallas_src>
import functools

import jax
import jax.numpy as jnp
from jax.experimental import pallas as pl
from jax.experimental.pallas import tpu as pltpu

HIDDEN = 256


def _sigmoid(x):
    # sigmoid(x) == 0.5*tanh(0.5*x) + 0.5 : one EUP tanh pass per gate instead
    # of a possible exp + reciprocal lowering.
    return 0.5 * jnp.tanh(0.5 * x) + 0.5


# ---------------------------------------------------------------------------
# Kernels
# ---------------------------------------------------------------------------
def _ppo_kernel_nostate(x_ref, wfc_ref, bfc_ref, wih_ref, blstm_ref,
                        whead_ref, bhead_ref,
                        fused_ref, h_out_ref, c_out_ref, *, hidden):
    """Forward with zero initial LSTM state (self.hidden is None).

    x_ref is bf16; only the wih half of the stacked LSTM weight is DMA'd.
    h0 == 0 -> the whh matmul and the forget-gate work are skipped.
    """
    H = hidden
    hfc = (jnp.dot(x_ref[...], wfc_ref[...], preferred_element_type=jnp.float32)
           + bfc_ref[...])
    hfc = jnp.maximum(hfc, 0.0)

    gates = (jnp.dot(hfc.astype(jnp.bfloat16), wih_ref[...],
                     preferred_element_type=jnp.float32) + blstm_ref[...])
    i_g = _sigmoid(gates[:, 0 * H:1 * H])
    # forget gate only multiplies c0 == 0 -> skipped entirely
    g_g = jnp.tanh(gates[:, 2 * H:3 * H])
    o_g = _sigmoid(gates[:, 3 * H:4 * H])

    c_new = i_g * g_g
    h_new = o_g * jnp.tanh(c_new)
    h_bf16 = h_new.astype(jnp.bfloat16)

    # fused lane-dense (blk, 128) head output: [logits | value | zero pad]
    fused_ref[...] = (jnp.dot(h_bf16, whead_ref[...],
                              preferred_element_type=jnp.float32) + bhead_ref[...])
    h_out_ref[...] = h_bf16
    c_out_ref[...] = c_new


def _ppo_kernel_state(x_ref, h0_ref, c0_ref, wfc_ref, bfc_ref, wlstm_ref,
                      blstm_ref, whead_ref, bhead_ref,
                      fused_ref, h_out_ref, c_out_ref, *, hidden):
    """Forward with carried LSTM state.

    x_ref / h0_ref are bf16, c0_ref is f32.  No lane concat: gates come from
    two MXU dots on static sublane slices of the stacked (2H, 4H) weight.
    """
    H = hidden
    hfc = (jnp.dot(x_ref[...], wfc_ref[...], preferred_element_type=jnp.float32)
           + bfc_ref[...])
    hfc = jnp.maximum(hfc, 0.0)

    gates = (jnp.dot(hfc.astype(jnp.bfloat16), wlstm_ref[:H, :],
                     preferred_element_type=jnp.float32)
             + jnp.dot(h0_ref[...], wlstm_ref[H:, :],
                       preferred_element_type=jnp.float32)
             + blstm_ref[...])
    i_g = _sigmoid(gates[:, 0 * H:1 * H])
    f_g = _sigmoid(gates[:, 1 * H:2 * H])
    g_g = jnp.tanh(gates[:, 2 * H:3 * H])
    o_g = _sigmoid(gates[:, 3 * H:4 * H])

    c_new = f_g * c0_ref[...] + i_g * g_g
    h_new = o_g * jnp.tanh(c_new)
    h_bf16 = h_new.astype(jnp.bfloat16)

    fused_ref[...] = (jnp.dot(h_bf16, whead_ref[...],
                              preferred_element_type=jnp.float32) + bhead_ref[...])
    h_out_ref[...] = h_bf16
    c_out_ref[...] = c_new


# ---------------------------------------------------------------------------
# Wrapper
# ---------------------------------------------------------------------------
def prepare_params(params, compute_dtype=jnp.bfloat16):
    """One-time layout prep (hoisted out of the per-call path)."""
    H = HIDDEN
    A = int(params["wp"].shape[0])
    obs_dim = int(params["wfc"].shape[1])
    obs_pad = ((obs_dim + 127) // 128) * 128       # MXU-aligned fc K dim
    head_n = ((A + 1 + 127) // 128) * 128          # lane-dense fused head width

    wfc = params["wfc"].T                                              # (obs, H)
    wfc = jnp.pad(wfc, ((0, obs_pad - obs_dim), (0, 0))).astype(compute_dtype)
    bfc = params["bfc"][None, :].astype(jnp.float32)                   # (1, H)
    wlstm = jnp.concatenate([params["wih"].T, params["whh"].T],
                            axis=0).astype(compute_dtype)              # (2H, 4H)
    blstm = (params["bih"] + params["bhh"])[None, :].astype(jnp.float32)  # (1, 4H)

    w_head = jnp.concatenate([params["wp"], params["wv"]], axis=0).T   # (H, A+1)
    w_head = jnp.pad(w_head, ((0, 0), (0, head_n - (A + 1)))).astype(compute_dtype)
    b_head = jnp.pad(jnp.concatenate([params["bp"], params["bv"]]),
                     (0, head_n - (A + 1)))[None, :].astype(jnp.float32)

    return dict(wfc=wfc, bfc=bfc, wlstm=wlstm, blstm=blstm,
                whead=w_head, bhead=b_head,
                action_dim=A, obs_dim=obs_dim, obs_pad=obs_pad)


def _batch_blocking(B0):
    """Returns (padded_B, block_rows).  Pads instead of shrinking the block."""
    if B0 <= 16:
        Bp = max(8, ((B0 + 7) // 8) * 8)
        return Bp, Bp                           # single small block
    if B0 <= 512:
        # >=2 parallel blocks so both TensorCores run on v7x; 16-row multiples
        # keep bf16 outputs tile-aligned.
        half = ((((B0 + 1) // 2) + 15) // 16) * 16
        return 2 * half, half
    blk = 256                                   # large batches: MXU-sized blocks
    Bp = ((B0 + blk - 1) // blk) * blk
    return Bp, blk


def ppo_actor_critic_forward(x, prep, hidden=None):
    """x: (B, obs_dim) f32/bf16.  Returns (logits, value, (h, c)) like the module.

    Returned hidden h is bf16 (next-step matmul operand), c is f32.
    """
    B0, obs_dim0 = x.shape
    H = HIDDEN
    A = prep["action_dim"]
    obs_pad = prep["obs_pad"]
    head_n = prep["whead"].shape[1]

    Bp, blk = _batch_blocking(B0)
    x = jnp.pad(x.astype(jnp.bfloat16),
                ((0, Bp - B0), (0, obs_pad - obs_dim0)))

    grid = (Bp // blk,)
    row = lambda i: (i, 0)
    const = lambda i: (0, 0)

    out_shape = (
        jax.ShapeDtypeStruct((Bp, head_n), jnp.float32),   # fused [logits|value|pad]
        jax.ShapeDtypeStruct((Bp, H), jnp.bfloat16),       # new h (bf16 for reuse)
        jax.ShapeDtypeStruct((Bp, H), jnp.float32),        # new c
    )
    out_specs = (
        pl.BlockSpec((blk, head_n), row),
        pl.BlockSpec((blk, H), row),
        pl.BlockSpec((blk, H), row),
    )
    cparams = pltpu.CompilerParams(dimension_semantics=("parallel",))

    if hidden is None:
        # Fast path: only the wih half (rows 0:H) of the stacked LSTM weight
        # is DMA'd (block (H, 4H) at block index (0, 0)); no h0/c0 inputs.
        in_specs = [
            pl.BlockSpec((blk, obs_pad), row),    # x (bf16)
            pl.BlockSpec((obs_pad, H), const),    # wfc (bf16)
            pl.BlockSpec((1, H), const),          # bfc
            pl.BlockSpec((H, 4 * H), const),      # wih.T (rows 0:H of wlstm)
            pl.BlockSpec((1, 4 * H), const),      # bih + bhh
            pl.BlockSpec((H, head_n), const),     # fused heads
            pl.BlockSpec((1, head_n), const),
        ]
        fused, h_new, c_new = pl.pallas_call(
            functools.partial(_ppo_kernel_nostate, hidden=H),
            grid=grid, in_specs=in_specs, out_specs=out_specs,
            out_shape=out_shape, compiler_params=cparams,
        )(x, prep["wfc"], prep["bfc"], prep["wlstm"], prep["blstm"],
          prep["whead"], prep["bhead"])
    else:
        h0, c0 = hidden
        h0 = jnp.pad(h0.astype(jnp.bfloat16), ((0, Bp - B0), (0, 0)))
        c0 = jnp.pad(c0.astype(jnp.float32), ((0, Bp - B0), (0, 0)))
        in_specs = [
            pl.BlockSpec((blk, obs_pad), row),    # x (bf16)
            pl.BlockSpec((blk, H), row),          # h0 (bf16)
            pl.BlockSpec((blk, H), row),          # c0 (f32)
            pl.BlockSpec((obs_pad, H), const),    # wfc
            pl.BlockSpec((1, H), const),          # bfc
            pl.BlockSpec((2 * H, 4 * H), const),  # [wih.T ; whh.T]
            pl.BlockSpec((1, 4 * H), const),      # bih + bhh
            pl.BlockSpec((H, head_n), const),     # fused heads
            pl.BlockSpec((1, head_n), const),
        ]
        fused, h_new, c_new = pl.pallas_call(
            functools.partial(_ppo_kernel_state, hidden=H),
            grid=grid, in_specs=in_specs, out_specs=out_specs,
            out_shape=out_shape, compiler_params=cparams,
        )(x, h0, c0,
          prep["wfc"], prep["bfc"], prep["wlstm"], prep["blstm"],
          prep["whead"], prep["bhead"])

    logits = fused[:B0, :A]
    value = fused[:B0, A:A + 1]
    return logits, value, (h_new[:B0], c_new[:B0])


# ---------------------------------------------------------------------------
# Params / references
# ---------------------------------------------------------------------------
def _init_params(key, obs_dim, action_dim):
    H = HIDDEN
    ks = jax.random.split(key, 10)

    def lin(kw, kb, out_f, in_f):
        bound = 1.0 / jnp.sqrt(jnp.float32(in_f))
        w = jax.random.uniform(kw, (out_f, in_f), jnp.float32, -bound, bound)
        b = jax.random.uniform(kb, (out_f,), jnp.float32, -bound, bound)
        return w, b

    wfc, bfc = lin(ks[0], ks[1], H, obs_dim)
    wih, bih = lin(ks[2], ks[3], 4 * H, H)
    whh, bhh = lin(ks[4], ks[5], 4 * H, H)
    wp, bp = lin(ks[6], ks[7], action_dim, H)
    wv, bv = lin(ks[8], ks[9], 1, H)
    return dict(wfc=wfc, bfc=bfc, wih=wih, bih=bih, whh=whh, bhh=bhh,
                wp=wp, bp=bp, wv=wv, bv=bv)


def _reference_forward_f32(x, params, hidden=None):
    """Pure-f32 PyTorch-semantics reference."""
    H = HIDDEN
    B = x.shape[0]
    hfc = jnp.maximum(x @ params["wfc"].T + params["bfc"], 0.0)
    if hidden is None:
        h0 = jnp.zeros((B, H), jnp.float32)
        c0 = jnp.zeros((B, H), jnp.float32)
    else:
        h0, c0 = hidden
        h0 = h0.astype(jnp.float32)
        c0 = c0.astype(jnp.float32)
    gates = (hfc @ params["wih"].T + params["bih"]
             + h0 @ params["whh"].T + params["bhh"])
    i_g = jax.nn.sigmoid(gates[:, 0 * H:1 * H])
    f_g = jax.nn.sigmoid(gates[:, 1 * H:2 * H])
    g_g = jnp.tanh(gates[:, 2 * H:3 * H])
    o_g = jax.nn.sigmoid(gates[:, 3 * H:4 * H])
    c = f_g * c0 + i_g * g_g
    h = o_g * jnp.tanh(c)
    logits = h @ params["wp"].T + params["bp"]
    value = h @ params["wv"].T + params["bv"]
    return logits, value, (h, c)


def _bf16_dot(a, b):
    return jnp.dot(a.astype(jnp.bfloat16), b.astype(jnp.bfloat16),
                   preferred_element_type=jnp.float32)


def _reference_forward_bf16(x, prep, hidden=None):
    """Reference mirroring the kernel's bf16-matmul / f32-accumulate recipe."""
    H = HIDDEN
    A = prep["action_dim"]
    obs_pad = prep["obs_pad"]
    x = jnp.pad(x, ((0, 0), (0, obs_pad - x.shape[1])))
    hfc = jnp.maximum(_bf16_dot(x, prep["wfc"]) + prep["bfc"], 0.0)
    if hidden is None:
        gates = _bf16_dot(hfc, prep["wlstm"][:H]) + prep["blstm"]
        f_c0 = 0.0
    else:
        h0, c0 = hidden
        gates = (_bf16_dot(hfc, prep["wlstm"][:H])
                 + _bf16_dot(h0, prep["wlstm"][H:]) + prep["blstm"])
        f_c0 = jax.nn.sigmoid(gates[:, 1 * H:2 * H]) * c0.astype(jnp.float32)
    i_g = jax.nn.sigmoid(gates[:, 0 * H:1 * H])
    g_g = jnp.tanh(gates[:, 2 * H:3 * H])
    o_g = jax.nn.sigmoid(gates[:, 3 * H:4 * H])
    c = f_c0 + i_g * g_g
    h = o_g * jnp.tanh(c)
    fused = _bf16_dot(h, prep["whead"]) + prep["bhead"]
    return fused[:, :A], fused[:, A:A + 1], (h, c)


if __name__ == "__main__":
    B, OBS_DIM, ACTION_DIM = 8, 84, 8   # OBS_DIM=84 exercises the K-dim padding

    key = jax.random.PRNGKey(0)
    k_x1, k_x2, k_p = jax.random.split(key, 3)
    x1 = jax.random.normal(k_x1, (B, OBS_DIM), jnp.float32)
    x2 = jax.random.normal(k_x2, (B, OBS_DIM), jnp.float32)

    params = _init_params(k_p, OBS_DIM, ACTION_DIM)
    prep = prepare_params(params)          # one-time layout / bf16 packing

    # Step 1: self.hidden is None (zero-state fast path, no whh matmul / DMA).
    logits1, value1, hid1 = ppo_actor_critic_forward(x1, prep, hidden=None)
    # Step 2: carried hidden state (two-dot recurrent path, bf16 h0 reuse).
    logits2, value2, hid2 = ppo_actor_critic_forward(x2, prep, hidden=hid1)
    jax.block_until_ready((logits1, value1, logits2, value2, hid2))

    assert logits1.shape == (B, ACTION_DIM) and value1.shape == (B, 1)
    assert hid1[0].shape == (B, HIDDEN) and hid1[1].shape == (B, HIDDEN)
    assert logits2.shape == (B, ACTION_DIM) and value2.shape == (B, 1)

    # Tight check vs. a reference with the identical bf16-matmul recipe.
    rl1, rv1, _ = _reference_forward_bf16(x1, prep, hidden=None)
    rl2, rv2, _ = _reference_forward_bf16(x2, prep, hidden=hid1)
    assert jnp.allclose(logits1, rl1, atol=2e-3, rtol=2e-3)
    assert jnp.allclose(value1, rv1, atol=2e-3, rtol=2e-3)
    assert jnp.allclose(logits2, rl2, atol=2e-3, rtol=2e-3)
    assert jnp.allclose(value2, rv2, atol=2e-3, rtol=2e-3)

    # Looser sanity check vs. the pure-f32 PyTorch-semantics reference.
    fl1, fv1, _ = _reference_forward_f32(x1, params, hidden=None)
    fl2, fv2, _ = _reference_forward_f32(x2, params, hidden=hid1)
    assert jnp.allclose(logits1, fl1, atol=3e-2, rtol=3e-2)
    assert jnp.allclose(value1, fv1, atol=3e-2, rtol=3e-2)
    assert jnp.allclose(logits2, fl2, atol=3e-2, rtol=3e-2)
    assert jnp.allclose(value2, fv2, atol=3e-2, rtol=3e-2)

    print("KERNEL_OK")
</pallas_src>

<mosaic_0001>
module attributes {stable_mosaic.version = 11 : i64} {
  func.func @_ppo_kernel_nostate(%arg0: i32, %arg1: memref<8x128xbf16, #tpu.memory_space<vmem>>, %arg2: memref<128x256xbf16, #tpu.memory_space<vmem>>, %arg3: memref<1x256xf32, #tpu.memory_space<vmem>>, %arg4: memref<256x1024xbf16, #tpu.memory_space<vmem>>, %arg5: memref<1x1024xf32, #tpu.memory_space<vmem>>, %arg6: memref<256x128xbf16, #tpu.memory_space<vmem>>, %arg7: memref<1x128xf32, #tpu.memory_space<vmem>>, %arg8: memref<8x128xf32, #tpu.memory_space<vmem>>, %arg9: memref<8x256xbf16, #tpu.memory_space<vmem>>, %arg10: memref<8x256xf32, #tpu.memory_space<vmem>>) attributes {dimension_semantics = [#tpu.dimension_semantics<parallel>], iteration_bounds = array<i64: 1>, scalar_prefetch = 0 : i64, scratch_operands = 0 : i64, tpu.core_type = #tpu.core_type<tc>, window_params = [{transform_indices = @transform_0, window_bounds = array<i64: 8, 128>}, {pipeline_mode = #tpu.pipeline_mode<synchronous>, transform_indices = @transform_1, window_bounds = array<i64: 128, 256>}, {pipeline_mode = #tpu.pipeline_mode<synchronous>, transform_indices = @transform_2, window_bounds = array<i64: 1, 256>}, {transform_indices = @transform_3, window_bounds = array<i64: 256, 1024>}, {pipeline_mode = #tpu.pipeline_mode<synchronous>, transform_indices = @transform_4, window_bounds = array<i64: 1, 1024>}, {pipeline_mode = #tpu.pipeline_mode<synchronous>, transform_indices = @transform_5, window_bounds = array<i64: 256, 128>}, {pipeline_mode = #tpu.pipeline_mode<synchronous>, transform_indices = @transform_6, window_bounds = array<i64: 1, 128>}, {transform_indices = @transform_7, window_bounds = array<i64: 8, 128>}, {transform_indices = @transform_8, window_bounds = array<i64: 8, 256>}, {transform_indices = @transform_9, window_bounds = array<i64: 8, 256>}]} {
    %c0 = arith.constant 0 : index
    %c0_0 = arith.constant 0 : index
    %0 = vector.load %arg1[%c0, %c0_0] : memref<8x128xbf16, #tpu.memory_space<vmem>>, vector<8x128xbf16>
    %c0_1 = arith.constant 0 : index
    %c0_2 = arith.constant 0 : index
    %1 = vector.load %arg2[%c0_1, %c0_2] : memref<128x256xbf16, #tpu.memory_space<vmem>>, vector<128x256xbf16>
    %cst = arith.constant dense<0.000000e+00> : vector<8x256xf32>
    %2 = tpu.matmul %0, %1, %cst {dimension_numbers = #tpu.dot_dimension_numbers<[1], [0], [0], [1], [0, 0, 1, 1], [], []>} : vector<8x128xbf16>, vector<128x256xbf16>, vector<8x256xf32> -> vector<8x256xf32>
    %c0_3 = arith.constant 0 : index
    %c0_4 = arith.constant 0 : index
    %3 = vector.load %arg3[%c0_3, %c0_4] : memref<1x256xf32, #tpu.memory_space<vmem>>, vector<1x256xf32>
    %4 = vector.broadcast %3 : vector<1x256xf32> to vector<8x256xf32>
    %5 = arith.addf %2, %4 : vector<8x256xf32>
    %cst_5 = arith.constant 0.000000e+00 : f32
    %6 = vector.broadcast %cst_5 : f32 to vector<8x256xf32>
    %7 = arith.maximumf %5, %6 : vector<8x256xf32>
    %8 = arith.truncf %7 : vector<8x256xf32> to vector<8x256xbf16>
    %c0_6 = arith.constant 0 : index
    %c0_7 = arith.constant 0 : index
    %9 = vector.load %arg4[%c0_6, %c0_7] : memref<256x1024xbf16, #tpu.memory_space<vmem>>, vector<256x1024xbf16>
    %cst_8 = arith.constant dense<0.000000e+00> : vector<8x1024xf32>
    %10 = tpu.matmul %8, %9, %cst_8 {dimension_numbers = #tpu.dot_dimension_numbers<[1], [0], [0], [1], [0, 0, 1, 1], [], []>} : vector<8x256xbf16>, vector<256x1024xbf16>, vector<8x1024xf32> -> vector<8x1024xf32>
    %c0_9 = arith.constant 0 : index
    %c0_10 = arith.constant 0 : index
    %11 = vector.load %arg5[%c0_9, %c0_10] : memref<1x1024xf32, #tpu.memory_space<vmem>>, vector<1x1024xf32>
    %12 = vector.broadcast %11 : vector<1x1024xf32> to vector<8x1024xf32>
    %13 = arith.addf %10, %12 : vector<8x1024xf32>
    %14 = vector.extract_strided_slice %13 {offsets = [0, 0], sizes = [8, 256], strides = [1, 1]} : vector<8x1024xf32> to vector<8x256xf32>
    %cst_11 = arith.constant 5.000000e-01 : f32
    %15 = vector.broadcast %cst_11 : f32 to vector<8x256xf32>
    %16 = arith.mulf %15, %14 : vector<8x256xf32>
    %17 = math.tanh %16 : vector<8x256xf32>
    %cst_12 = arith.constant 5.000000e-01 : f32
    %18 = vector.broadcast %cst_12 : f32 to vector<8x256xf32>
    %19 = arith.mulf %18, %17 : vector<8x256xf32>
    %cst_13 = arith.constant 5.000000e-01 : f32
    %20 = vector.broadcast %cst_13 : f32 to vector<8x256xf32>
    %21 = arith.addf %19, %20 : vector<8x256xf32>
    %22 = vector.extract_strided_slice %13 {offsets = [0, 512], sizes = [8, 256], strides = [1, 1]} : vector<8x1024xf32> to vector<8x256xf32>
    %23 = math.tanh %22 : vector<8x256xf32>
    %24 = vector.extract_strided_slice %13 {offsets = [0, 768], sizes = [8, 256], strides = [1, 1]} : vector<8x1024xf32> to vector<8x256xf32>
    %cst_14 = arith.constant 5.000000e-01 : f32
    %25 = vector.broadcast %cst_14 : f32 to vector<8x256xf32>
    %26 = arith.mulf %25, %24 : vector<8x256xf32>
    %27 = math.tanh %26 : vector<8x256xf32>
    %cst_15 = arith.constant 5.000000e-01 : f32
    %28 = vector.broadcast %cst_15 : f32 to vector<8x256xf32>
    %29 = arith.mulf %28, %27 : vector<8x256xf32>
    %cst_16 = arith.constant 5.000000e-01 : f32
    %30 = vector.broadcast %cst_16 : f32 to vector<8x256xf32>
    %31 = arith.addf %29, %30 : vector<8x256xf32>
    %32 = arith.mulf %21, %23 : vector<8x256xf32>
    %33 = math.tanh %32 : vector<8x256xf32>
    %34 = arith.mulf %31, %33 : vector<8x256xf32>
    %35 = arith.truncf %34 : vector<8x256xf32> to vector<8x256xbf16>
    %c0_17 = arith.constant 0 : index
    %c0_18 = arith.constant 0 : index
    %36 = vector.load %arg6[%c0_17, %c0_18] : memref<256x128xbf16, #tpu.memory_space<vmem>>, vector<256x128xbf16>
    %cst_19 = arith.constant dense<0.000000e+00> : vector<8x128xf32>
    %37 = tpu.matmul %35, %36, %cst_19 {dimension_numbers = #tpu.dot_dimension_numbers<[1], [0], [0], [1], [0, 0, 1, 1], [], []>} : vector<8x256xbf16>, vector<256x128xbf16>, vector<8x128xf32> -> vector<8x128xf32>
    %c0_20 = arith.constant 0 : index
    %c0_21 = arith.constant 0 : index
    %38 = vector.load %arg7[%c0_20, %c0_21] : memref<1x128xf32, #tpu.memory_space<vmem>>, vector<1x128xf32>
    %39 = vector.broadcast %38 : vector<1x128xf32> to vector<8x128xf32>
    %40 = arith.addf %37, %39 : vector<8x128xf32>
    %c0_22 = arith.constant 0 : index
    %c0_23 = arith.constant 0 : index
    %41 = vector.load %arg8[%c0_22, %c0_23] : memref<8x128xf32, #tpu.memory_space<vmem>>, vector<8x128xf32>
    tpu.vector_store %arg8[%c0_22, %c0_23], %40 {strides = array<i32>} : memref<8x128xf32, #tpu.memory_space<vmem>>, vector<8x128xf32>,
    %c0_24 = arith.constant 0 : index
    %c0_25 = arith.constant 0 : index
    %42 = vector.load %arg9[%c0_24, %c0_25] : memref<8x256xbf16, #tpu.memory_space<vmem>>, vector<8x256xbf16>
    tpu.vector_store %arg9[%c0_24, %c0_25], %35 {strides = array<i32>} : memref<8x256xbf16, #tpu.memory_space<vmem>>, vector<8x256xbf16>,
    %c0_26 = arith.constant 0 : index
    %c0_27 = arith.constant 0 : index
    %43 = vector.load %arg10[%c0_26, %c0_27] : memref<8x256xf32, #tpu.memory_space<vmem>>, vector<8x256xf32>
    tpu.vector_store %arg10[%c0_26, %c0_27], %32 {strides = array<i32>} : memref<8x256xf32, #tpu.memory_space<vmem>>, vector<8x256xf32>,
    return
  }
  func.func @transform_0(%arg0: i32) -> (i32, i32) {
    %c0_i32 = arith.constant 0 : i32
    %c0_i32_0 = arith.constant 0 : i32
    return %arg0, %c0_i32 : i32, i32
  }
  func.func @transform_1(%arg0: i32) -> (i32, i32) {
    %c0_i32 = arith.constant 0 : i32
    %c0_i32_0 = arith.constant 0 : i32
    %c0_i32_1 = arith.constant 0 : i32
    return %c0_i32, %c0_i32_0 : i32, i32
  }
  func.func @transform_2(%arg0: i32) -> (i32, i32) {
    %c0_i32 = arith.constant 0 : i32
    %c0_i32_0 = arith.constant 0 : i32
    %c0_i32_1 = arith.constant 0 : i32
    return %c0_i32, %c0_i32_0 : i32, i32
  }
  func.func @transform_3(%arg0: i32) -> (i32, i32) {
    %c0_i32 = arith.constant 0 : i32
    %c0_i32_0 = arith.constant 0 : i32
    %c0_i32_1 = arith.constant 0 : i32
    return %c0_i32, %c0_i32_0 : i32, i32
  }
  func.func @transform_4(%arg0: i32) -> (i32, i32) {
    %c0_i32 = arith.constant 0 : i32
    %c0_i32_0 = arith.constant 0 : i32
    %c0_i32_1 = arith.constant 0 : i32
    return %c0_i32, %c0_i32_0 : i32, i32
  }
  func.func @transform_5(%arg0: i32) -> (i32, i32) {
    %c0_i32 = arith.constant 0 : i32
    %c0_i32_0 = arith.constant 0 : i32
    %c0_i32_1 = arith.constant 0 : i32
    return %c0_i32, %c0_i32_0 : i32, i32
  }
  func.func @transform_6(%arg0: i32) -> (i32, i32) {
    %c0_i32 = arith.constant 0 : i32
    %c0_i32_0 = arith.constant 0 : i32
    %c0_i32_1 = arith.constant 0 : i32
    return %c0_i32, %c0_i32_0 : i32, i32
  }
  func.func @transform_7(%arg0: i32) -> (i32, i32) {
    %c0_i32 = arith.constant 0 : i32
    %c0_i32_0 = arith.constant 0 : i32
    return %arg0, %c0_i32 : i32, i32
  }
  func.func @transform_8(%arg0: i32) -> (i32, i32) {
    %c0_i32 = arith.constant 0 : i32
    %c0_i32_0 = arith.constant 0 : i32
    return %arg0, %c0_i32 : i32, i32
  }
  func.func @transform_9(%arg0: i32) -> (i32, i32) {
    %c0_i32 = arith.constant 0 : i32
    %c0_i32_0 = arith.constant 0 : i32
    return %arg0, %c0_i32 : i32, i32
  }
}

</mosaic_0001>

<bundles_post_ra>
// kernel: tpu_custom_call.1
= control target key start
LH: loop header
LB: loop body
LE: loop exit
PB: predicated region body
PF: predicated region fallthrough
CT: control target
= control target key end

     0   :  { %15 = vsyncpa [#allocation3], 0  ;;  %s1793_s0 = inlined_call_operand.hbm [shape: bf16[8,128], index: 0, kind: input, shape index: {}]   ;;  %s1794_s1 = inlined_call_operand.hbm [shape: bf16[128,256], index: 1, kind: input, shape index: {}]   ;;  %s1795_s2 = inlined_call_operand.vmem [shape: f32[1,256], index: 2, kind: input, shape index: {}]   ;;  %s1796_s3 = inlined_call_operand.hbm [shape: bf16[512,1024], index: 3, kind: input, shape index: {}]   ;;  %s1797_s4 = inlined_call_operand.vmem [shape: f32[1,1024], index: 4, kind: input, shape index: {}]   ;;  %s1798_s5 = inlined_call_operand.hbm [shape: bf16[256,128], index: 5, kind: input, shape index: {}]   ;;  %s1799_s6 = inlined_call_operand.vmem [shape: f32[1,128], index: 6, kind: input, shape index: {}]   ;;  %s1800_s7 = inlined_call_operand.hbm [shape: f32[8,128], index: 7, kind: output, shape index: {0}]   ;;  %s1801_s8 = inlined_call_operand.hbm [shape: bf16[8,256], index: 8, kind: output, shape index: {1}]   ;;  %s1802_s9 = inlined_call_operand.hbm [shape: f32[8,256], index: 9, kind: output, shape index: {2}]  }
   0x1   :  { %16 = vsyncpa [#allocation6], 0 }
   0x2   :  { %17 = vsyncpa [#allocation9], 0 }
   0x3   :  { %18 = vsyncpa [#allocation4], 0 }
   0x4   :  { %19 = vsyncpa [#allocation12], 0  ;;  %s1612_s30 = smov [#allocation5]   ;;  %s1448_s13 = scalar_lea.hbm %s1794_s1, 2048 }
   0x5   :  { %s35_s10 = sshll.u32 %s1612_s30, 4  ;;  %p1449_p0 = scmp.ne.s32.totalorder %s1794_s1, %s1448_s13  ;;  %s36_s10 = int_to_ptr.vmem [resolvable:$true] %s35_s10 }
   0x6   :  { %p1452_p1 = scmp.lt.u32.totalorder %s1448_s13, %s1794_s1 }
   0x8   :  { %p1454_p2 = pnand %p1452_p1, %p1449_p0 }
   0xa   :  { %1457 = shalt.err (!%p1454_p2)
}
   0xb   :  { %s1458_s18 = scalar_lea.vmem %s36_s10, 2048  ;;  %p1463_p4 = scmp.lt.s32.totalorder %s36_s10, %s36_s10 }
   0xc   :  { %p1459_p3 = scmp.ne.s32.totalorder %s36_s10, %s1458_s18  ;;  %p1464_p5 = scmp.lt.s32.totalorder %s1458_s18, %s1458_s18 }
   0xe   :  { %p1465_p6 = por %p1464_p5, %p1463_p4 }
  0x10   :  { %p1466_p7 = pnand %p1465_p6, %p1459_p3 }
  0x12   :  { %1469 = shalt.err (!%p1466_p7)
}
  0x13   :  { %s1613_s19 = smov 128   ;;  %s1614_s20 = smov 8  }
  0x14   :  { %41 = dma.hbm_to_vmem [thread:$0]  %s1794_s1, 2048, %s36_s10, [#allocation6], %s1613_s19, %s1613_s19, %s1614_s20  }
  0x15   :  { %s1615_s23 = smov [#allocation2]   ;;  %s1616_s25 = smov [#allocation7]  }
  0x16   :  { %s26_s24 = sshll.u32 %s1615_s23, 4  ;;  %s49_s26 = sshll.u32 %s1616_s25, 4  ;;  %s27_s24 = int_to_ptr.vmem [resolvable:$true] %s26_s24  ;;  %s50_s26 = int_to_ptr.vmem [resolvable:$true] %s49_s26 }
  0x17   :  { %s1470_s29 = scalar_lea.hbm %s1793_s0, 64 }
  0x18   :  { %p1471_p8 = scmp.ne.s32.totalorder %s1793_s0, %s1470_s29  ;;  %p1474_p9 = scmp.lt.u32.totalorder %s1470_s29, %s1793_s0 }
  0x1a   :  { %p1476_p10 = pnand %p1474_p9, %p1471_p8 }
  0x1c   :  { %1479 = shalt.err (!%p1476_p10)
}
  0x1d   :  { %s1480_s1 = scalar_lea.vmem %s27_s24, 64  ;;  %p1485_p12 = scmp.lt.s32.totalorder %s27_s24, %s27_s24 }
  0x1e   :  { %p1481_p11 = scmp.ne.s32.totalorder %s27_s24, %s1480_s1  ;;  %p1486_p13 = scmp.lt.s32.totalorder %s1480_s1, %s1480_s1 }
  0x20   :  { %p1487_p0 = por %p1486_p13, %p1485_p12 }
  0x22   :  { %p1488_p1 = pnand %p1487_p0, %p1481_p11 }
  0x24   :  { %1491 = shalt.err (!%p1488_p1)
}
  0x25   :  { %29 = dma.hbm_to_vmem [thread:$0]  %s1793_s0, 64, %s27_s24, [#allocation3]  }
  0x26   :  { %s1492_s17 = scalar_lea.hbm %s1796_s3, 16384  ;;  %s1494_s22 = scalar_lea.hbm %s1796_s3, 32768 }
  0x27   :  { %p1493_p2 = scmp.ne.s32.totalorder %s1796_s3, %s1492_s17  ;;  %p1495_p3 = scmp.lt.u32.totalorder %s1494_s22, %s1492_s17 }
  0x28   :  { %p1496_p4 = scmp.lt.u32.totalorder %s1492_s17, %s1796_s3 }
  0x2a   :  { %p1497_p5 = por %p1496_p4, %p1495_p3 }
  0x2c   :  { %p1498_p6 = pnand %p1497_p5, %p1493_p2 }
  0x2e   :  { %1501 = shalt.err (!%p1498_p6)
}
  0x2f   :  { %s1502_s0 = scalar_lea.vmem %s50_s26, 16384  ;;  %p1507_p8 = scmp.lt.s32.totalorder %s50_s26, %s50_s26 }
  0x30   :  { %p1503_p7 = scmp.ne.s32.totalorder %s50_s26, %s1502_s0  ;;  %p1508_p9 = scmp.lt.s32.totalorder %s1502_s0, %s1502_s0 }
  0x32   :  { %p1509_p10 = por %p1508_p9, %p1507_p8 }
  0x34   :  { %p1510_p11 = pnand %p1509_p10, %p1503_p7 }
  0x36   :  { %1513 = shalt.err (!%p1510_p11)
}
  0x37   :  { %s1617_s24 = smov 512   ;;  %s1618_s27 = smov 32  }
  0x38   :  { %55 = dma.hbm_to_vmem [thread:$0]  %s1796_s3, 16384, %s50_s26, [#allocation6], %s1617_s24, %s1617_s24, %s1618_s27  }
  0x39   :  { %s1619_s30 = smov [#allocation8]   ;;  %s1514_s1 = scalar_lea.hbm %s1798_s5, 2048 }
  0x3a   :  { %s63_s11 = sshll.u32 %s1619_s30, 4  ;;  %p1515_p12 = scmp.ne.s32.totalorder %s1798_s5, %s1514_s1  ;;  %s64_s11 = int_to_ptr.vmem [resolvable:$true] %s63_s11 }
  0x3b   :  { %p1518_p13 = scmp.lt.u32.totalorder %s1514_s1, %s1798_s5 }
  0x3d   :  { %p1520_p0 = pnand %p1518_p13, %p1515_p12 }
  0x3f   :  { %1523 = shalt.err (!%p1520_p0)
}
  0x40   :  { %s1524_s17 = scalar_lea.vmem %s64_s11, 2048  ;;  %p1529_p2 = scmp.lt.s32.totalorder %s64_s11, %s64_s11 }
  0x41   :  { %p1525_p1 = scmp.ne.s32.totalorder %s64_s11, %s1524_s17  ;;  %p1530_p3 = scmp.lt.s32.totalorder %s1524_s17, %s1524_s17 }
  0x43   :  { %p1531_p4 = por %p1530_p3, %p1529_p2 }
  0x45   :  { %p1532_p5 = pnand %p1531_p4, %p1525_p1 }
  0x47   :  { %1535 = shalt.err (!%p1532_p5)
}
  0x48   :  { %s1620_s3 = smov 64   ;;  %s1621_s26 = smov 4  }
  0x49   :  { %69 = dma.hbm_to_vmem [thread:$0]  %s1798_s5, 2048, %s64_s11, [#allocation9], %s1620_s3, %s1620_s3, %s1621_s26  }
  0x4a   :  { %1602 = dma.done.wait [#allocation3], 64  }
  0x4b   :  { %1603 = vsyncadd [#allocation3], 4294967232 }
  0x4c   :  { %1604 = dma.done.wait [#allocation6], 18432  }
  0x4d   :  { %1605 = vsyncadd [#allocation6], 4294948864 }
  0x4e   :  { %1606 = dma.done.wait [#allocation9], 2048  }
  0x4f   :  { %1607 = vsyncadd [#allocation9], 4294965248  ;;  %v1622_v0 = vmov 0   ;;  %v1392_v1 = vld [vmem:[#allocation5 + $0x4] ss:$8 sps:$4 sm:$0xff]   ;;  %v240_v34 = vld [vmem:[#allocation7 + $0x10] sm:$0xff] }
  0x50   :  { %226 = vmatprep.mubr.bf16.mxu0 %v1622_v0  ;;  %v1394_v2 = vld [vmem:[#allocation5] ss:$8 sps:$4 sm:$0xff]   ;;  %194 = vmatprep.subr.bf16.mxu0 %v1392_v1  ;;  %v1395_v3 = vld [vmem:[#allocation5 + $0x14] ss:$8 sps:$4 sm:$0xff]   ;;  %v1397_v4 = vld [vmem:[#allocation5 + $0x10] ss:$8 sps:$4 sm:$0xff]  }
  0x51   :  { %195 = vmatpush1.bf16.msra.mxu0 %v1394_v2  ;;  %v1398_v5 = vld [vmem:[#allocation5 + $0x24] ss:$8 sps:$4 sm:$0xff]   ;;  %v1400_v6 = vld [vmem:[#allocation5 + $0x20] ss:$8 sps:$4 sm:$0xff]   ;;  %v1401_v7 = vld [vmem:[#allocation5 + $0x34] ss:$8 sps:$4 sm:$0xff]  }
  0x52   :  { %196 = vmatprep.subr.bf16.mxu0 %v1395_v3  ;;  %v1403_v8 = vld [vmem:[#allocation5 + $0x30] ss:$8 sps:$4 sm:$0xff]   ;;  %v239_v9 = vld [vmem:[#allocation7] sm:$0xff]  ;;  %v1407_v21 = vld [vmem:[#allocation5 + $0x54] ss:$8 sps:$4 sm:$0xff]  }
  0x53   :  { %v242_v10 = vld [vmem:[#allocation7 + $0x20] sm:$0xff]  ;;  %v1409_v25 = vld [vmem:[#allocation5 + $0x50] ss:$8 sps:$4 sm:$0xff]   ;;  %v1413_v33 = vld [vmem:[#allocation5 + $0x74] ss:$8 sps:$4 sm:$0xff]  }
  0x54   :  { %v1404_v11 = vld [vmem:[#allocation5 + $0x44] ss:$8 sps:$4 sm:$0xff]   ;;  %v1242_v12 = vcombine.high %v239_v9, %v242_v10  ;;  %v1241_v13 = vcombine.low %v239_v9, %v242_v10  ;;  %v1406_v19 = vld [vmem:[#allocation5 + $0x40] ss:$8 sps:$4 sm:$0xff]   ;;  %v243_v36 = vld [vmem:[#allocation7 + $0x30] sm:$0xff] }
  0x55   :  { %197 = vmatpush1.bf16.msra.mxu0 %v1397_v4  ;;  %v245_v14 = vld [vmem:[#allocation7 + $0x40] sm:$0xff]  ;;  %v1415_v39 = vld [vmem:[#allocation5 + $0x70] ss:$8 sps:$4 sm:$0xff]   ;;  %v1244_v41 = vcombine.high %v240_v34, %v243_v36  ;;  %v85_v44 = vld [vmem:[#allocation2] sm:$0xf]  ;;  %v1243_v48 = vcombine.low %v240_v34, %v243_v36 }
  0x56   :  { %198 = vmatprep.subr.bf16.mxu0 %v1398_v5  ;;  %v248_v15 = vld [vmem:[#allocation7 + $0x60] sm:$0xff]  ;;  %847 = vmatprep.subr.bf16.mxu1 %v1242_v12  ;;  %v246_v42 = vld [vmem:[#allocation7 + $0x50] sm:$0xff] }
  0x57   :  { %v1248_v16 = vcombine.high %v245_v14, %v248_v15  ;;  %v251_v17 = vld [vmem:[#allocation7 + $0x80] sm:$0xff]  ;;  %848 = vmatpush1.bf16.msra.mxu1 %v1241_v13  ;;  %v1247_v20 = vcombine.low %v245_v14, %v248_v15  ;;  %v249_v45 = vld [vmem:[#allocation7 + $0x70] sm:$0xff] }
  0x58   :  { %v254_v18 = vld [vmem:[#allocation7 + $0xa0] sm:$0xff]  ;;  %v252_v49 = vld [vmem:[#allocation7 + $0x90] sm:$0xff]  ;;  %v1250_v54 = vcombine.high %v246_v42, %v249_v45  ;;  %v1249_v56 = vcombine.low %v246_v42, %v249_v45 }
  0x59   :  { %199 = vmatpush1.bf16.msra.mxu0 %v1400_v6  ;;  %849 = vmatprep.subr.bf16.mxu1 %v1248_v16  ;;  %v1254_v22 = vcombine.high %v251_v17, %v254_v18  ;;  %v257_v23 = vld [vmem:[#allocation7 + $0xc0] sm:$0xff]  ;;  %v1253_v26 = vcombine.low %v251_v17, %v254_v18  ;;  %v255_v50 = vld [vmem:[#allocation7 + $0xb0] sm:$0xff] }
  0x5a   :  { %200 = vmatprep.subr.bf16.mxu0 %v1401_v7  ;;  %v260_v24 = vld [vmem:[#allocation7 + $0xe0] sm:$0xff]  ;;  %v258_v57 = vld [vmem:[#allocation7 + $0xd0] sm:$0xff]  ;;  %v1256_v62 = vcombine.high %v252_v49, %v255_v50  ;;  %v1255_v0 = vcombine.low %v252_v49, %v255_v50 }
  0x5b   :  { %850 = vmatpush1.bf16.msra.mxu1 %v1247_v20  ;;  %v1410_v27 = vld [vmem:[#allocation5 + $0x64] ss:$8 sps:$4 sm:$0xff]   ;;  %v1260_v28 = vcombine.high %v257_v23, %v260_v24  ;;  %v1412_v31 = vld [vmem:[#allocation5 + $0x60] ss:$8 sps:$4 sm:$0xff]   ;;  %v1259_v32 = vcombine.low %v257_v23, %v260_v24  ;;  %v261_v58 = vld [vmem:[#allocation7 + $0xf0] sm:$0xff] }
  0x5c   :  { %851 = vmatprep.subr.bf16.mxu1 %v1254_v22  ;;  %v263_v29 = vld [vmem:[#allocation7 + $0x100] sm:$0xff]  ;;  %v1262_v2 = vcombine.high %v258_v57, %v261_v58  ;;  %v264_v3 = vld [vmem:[#allocation7 + $0x110] sm:$0xff] }
  0x5d   :  { %201 = vmatpush1.bf16.msra.mxu0 %v1403_v8  ;;  %v266_v30 = vld [vmem:[#allocation7 + $0x120] sm:$0xff]  ;;  %v267_v5 = vld [vmem:[#allocation7 + $0x130] sm:$0xff]  ;;  %v1261_v8 = vcombine.low %v258_v57, %v261_v58 }
  0x5e   :  { %202 = vmatprep.subr.bf16.mxu0 %v1404_v11  ;;  %v1266_v35 = vcombine.high %v263_v29, %v266_v30  ;;  %v269_v37 = vld [vmem:[#allocation7 + $0x140] sm:$0xff]  ;;  %v1265_v40 = vcombine.low %v263_v29, %v266_v30  ;;  %v1268_v10 = vcombine.high %v264_v3, %v267_v5  ;;  %v270_v11 = vld [vmem:[#allocation7 + $0x150] sm:$0xff]  ;;  %v1267_v16 = vcombine.low %v264_v3, %v267_v5 }
  0x5f   :  { %852 = vmatpush1.bf16.msra.mxu1 %v1253_v26  ;;  %v272_v38 = vld [vmem:[#allocation7 + $0x160] sm:$0xff]  ;;  %v273_v13 = vld [vmem:[#allocation7 + $0x170] sm:$0xff] }
  0x60   :  { %853 = vmatprep.subr.bf16.mxu1 %v1260_v28  ;;  %v1272_v43 = vcombine.high %v269_v37, %v272_v38  ;;  %v275_v46 = vld [vmem:[#allocation7 + $0x180] sm:$0xff]  ;;  %v1271_v51 = vcombine.low %v269_v37, %v272_v38  ;;  %v1274_v18 = vcombine.high %v270_v11, %v273_v13  ;;  %v1273_v24 = vcombine.low %v270_v11, %v273_v13  ;;  %v285_v29 = vld [vmem:[#allocation7 + $0x1f0] sm:$0xff] }
  0x61   :  { %203 = vmatpush1.bf16.msra.mxu0 %v1406_v19  ;;  %v278_v47 = vld [vmem:[#allocation7 + $0x1a0] sm:$0xff]  ;;  %v276_v19 = vld [vmem:[#allocation7 + $0x190] sm:$0xff] }
  0x62   :  { %204 = vmatprep.subr.bf16.mxu0 %v1407_v21  ;;  %v281_v52 = vld [vmem:[#allocation7 + $0x1c0] sm:$0xff]  ;;  %v1278_v55 = vcombine.high %v275_v46, %v278_v47  ;;  %v1277_v59 = vcombine.low %v275_v46, %v278_v47  ;;  %v279_v21 = vld [vmem:[#allocation7 + $0x1b0] sm:$0xff] }
  0x63   :  { %854 = vmatpush1.bf16.msra.mxu1 %v1259_v32  ;;  %v284_v53 = vld [vmem:[#allocation7 + $0x1e0] sm:$0xff]  ;;  %v1280_v26 = vcombine.high %v276_v19, %v279_v21  ;;  %v1279_v32 = vcombine.low %v276_v19, %v279_v21  ;;  %v291_v37 = vld [vmem:[#allocation7 + $0x230] sm:$0xff]  ;;  %v244_v19 = vld [vmem:[#allocation7 + $0x38] sm:$0xff] }
  0x64   :  { %855 = vmatprep.subr.bf16.mxu1 %v1266_v35  ;;  %v287_v60 = vld [vmem:[#allocation7 + $0x200] sm:$0xff]  ;;  %v1284_v63 = vcombine.high %v281_v52, %v284_v53  ;;  %v1283_v1 = vcombine.low %v281_v52, %v284_v53  ;;  %v288_v35 = vld [vmem:[#allocation7 + $0x210] sm:$0xff] }
  0x65   :  { %205 = vmatpush1.bf16.msra.mxu0 %v1409_v25  ;;  %v290_v61 = vld [vmem:[#allocation7 + $0x220] sm:$0xff]  ;;  %v1292_v42 = vcombine.high %v288_v35, %v291_v37  ;;  %v297_v45 = vld [vmem:[#allocation7 + $0x270] sm:$0xff]  ;;  %v1291_v46 = vcombine.low %v288_v35, %v291_v37  ;;  %v247_v37 = vld [vmem:[#allocation7 + $0x58] sm:$0xff] }
  0x66   :  { %206 = vmatprep.subr.bf16.mxu0 %v1410_v27  ;;  %v1290_v4 = vcombine.high %v287_v60, %v290_v61  ;;  %v293_v6 = vld [vmem:[#allocation7 + $0x240] sm:$0xff]  ;;  %v1289_v9 = vcombine.low %v287_v60, %v290_v61  ;;  %v282_v27 = vld [vmem:[#allocation7 + $0x1d0] sm:$0xff] }
  0x67   :  { %856 = vmatpush1.bf16.msra.mxu1 %v1265_v40  ;;  %v296_v7 = vld [vmem:[#allocation7 + $0x260] sm:$0xff]  ;;  %v1286_v34 = vcombine.high %v282_v27, %v285_v29  ;;  %v1285_v40 = vcombine.low %v282_v27, %v285_v29  ;;  %v300_v49 = vld [vmem:[#allocation7 + $0x290] sm:$0xff] }
  0x68   :  { %857 = vmatprep.subr.bf16.mxu1 %v1272_v43  ;;  %v1296_v12 = vcombine.high %v293_v6, %v296_v7  ;;  %v299_v14 = vld [vmem:[#allocation7 + $0x280] sm:$0xff]  ;;  %v1295_v17 = vcombine.low %v293_v6, %v296_v7  ;;  %v303_v50 = vld [vmem:[#allocation7 + $0x2b0] sm:$0xff] }
  0x69   :  { %207 = vmatpush1.bf16.msra.mxu0 %v1412_v31  ;;  %v302_v15 = vld [vmem:[#allocation7 + $0x2a0] sm:$0xff]  ;;  %v1304_v52 = vcombine.high %v300_v49, %v303_v50  ;;  %v306_v53 = vld [vmem:[#allocation7 + $0x2d0] sm:$0xff] }
  0x6a   :  { %208 = vmatprep.subr.bf16.mxu0 %v1413_v33  ;;  %v1302_v20 = vcombine.high %v299_v14, %v302_v15  ;;  %v305_v22 = vld [vmem:[#allocation7 + $0x2c0] sm:$0xff]  ;;  %v1301_v25 = vcombine.low %v299_v14, %v302_v15  ;;  %v312_v57 = vld [vmem:[#allocation7 + $0x310] sm:$0xff] }
  0x6b   :  { %858 = vmatpush1.bf16.msra.mxu1 %v1271_v51  ;;  %v308_v23 = vld [vmem:[#allocation7 + $0x2e0] sm:$0xff]  ;;  %v315_v58 = vld [vmem:[#allocation7 + $0x330] sm:$0xff] }
  0x6c   :  { %859 = vmatprep.subr.bf16.mxu1 %v1278_v55  ;;  %v1308_v28 = vcombine.high %v305_v22, %v308_v23  ;;  %v311_v30 = vld [vmem:[#allocation7 + $0x300] sm:$0xff]  ;;  %v1307_v33 = vcombine.low %v305_v22, %v308_v23  ;;  %v1303_v55 = vcombine.low %v300_v49, %v303_v50  ;;  %v1316_v60 = vcombine.high %v312_v57, %v315_v58  ;;  %v318_v61 = vld [vmem:[#allocation7 + $0x350] sm:$0xff]  ;;  %v265_v50 = vld [vmem:[#allocation7 + $0x118] sm:$0xff] }
  0x6d   :  { %209 = vmatpush1.bf16.msra.mxu0 %v1415_v39  ;;  %v314_v31 = vld [vmem:[#allocation7 + $0x320] sm:$0xff]  ;;  %v324_v5 = vld [vmem:[#allocation7 + $0x390] sm:$0xff]  ;;  %v104_v22 = vlaneseq }
  0x6e   :  { %888 = vmatprep.subr.bf16.mxu0 %v1244_v41  ;;  %v1314_v36 = vcombine.high %v311_v30, %v314_v31  ;;  %v317_v38 = vld [vmem:[#allocation7 + $0x340] sm:$0xff]  ;;  %v1313_v41 = vcombine.low %v311_v30, %v314_v31  ;;  %v327_v6 = vld [vmem:[#allocation7 + $0x3b0] sm:$0xff] }
  0x6f   :  { %860 = vmatpush1.bf16.msra.mxu1 %v1277_v59  ;;  %v320_v39 = vld [vmem:[#allocation7 + $0x360] sm:$0xff]  ;;  %v330_v13 = vld [vmem:[#allocation7 + $0x3d0] sm:$0xff]  ;;  %v1727_v23 = vshrl.u32 %v104_v22, 7  ;;  %v319_v22 = vld [vmem:[#allocation7 + $0x358] sm:$0xff] }
  0x70   :  { %227 = vmatmul.mubr.bf16.vlgmr.msra.gmra.mrb[0].mxu0 %v85_v44  ;;  %861 = vmatprep.subr.bf16.mxu1 %v1284_v63  ;;  %v1320_v43 = vcombine.high %v317_v38, %v320_v39  ;;  %v294_v44 = vld [vmem:[#allocation7 + $0x250] sm:$0xff]  ;;  %v1319_v47 = vcombine.low %v317_v38, %v320_v39  ;;  %v1315_v63 = vcombine.low %v312_v57, %v315_v58  ;;  %v326_v3 = vld [vmem:[#allocation7 + $0x3a0] sm:$0xff]  ;;  %v250_v38 = vld [vmem:[#allocation7 + $0x78] sm:$0xff] }
  0x71   :  { %889 = vmatpush1.bf16.msra.mxu0 %v1243_v48  ;;  %v1298_v48 = vcombine.high %v294_v44, %v297_v45  ;;  %v1297_v51 = vcombine.low %v294_v44, %v297_v45  ;;  %v332_v11 = vld [vmem:[#allocation7 + $0x3e0] sm:$0xff]  ;;  %v333_v14 = vld [vmem:[#allocation7 + $0x3f0] sm:$0xff]  ;;  %v1251_v44 = vcombine.low %v247_v37, %v250_v38  ;;  %v277_v58 = vld [vmem:[#allocation7 + $0x198] sm:$0xff] }
  0x72   :  { %890 = vmatprep.subr.bf16.mxu0 %v1250_v54  ;;  %v309_v54 = vld [vmem:[#allocation7 + $0x2f0] sm:$0xff] }
  0x73   :  { %862 = vmatpush1.bf16.msra.mxu1 %v1283_v1  ;;  %v1309_v59 = vcombine.low %v306_v53, %v309_v54 }
  0x74   :  { %863 = vmatprep.subr.bf16.mxu1 %v1290_v4 }
  0x75   :  { %891 = vmatpush1.bf16.msra.mxu0 %v1249_v56  ;;  %v1310_v56 = vcombine.high %v306_v53, %v309_v54  ;;  %v271_v54 = vld [vmem:[#allocation7 + $0x158] sm:$0xff] }
  0x76   :  { %892 = vmatprep.subr.bf16.mxu0 %v1256_v62  ;;  %v321_v62 = vld [vmem:[#allocation7 + $0x370] sm:$0xff] }
  0x77   :  { %864 = vmatpush1.bf16.msra.mxu1 %v1289_v9  ;;  %v1321_v1 = vcombine.low %v318_v61, %v321_v62  ;;  %v1327_v9 = vcombine.low %v324_v5, %v327_v6 }
  0x78   :  { %865 = vmatprep.subr.bf16.mxu1 %v1296_v12 }
  0x79   :  { %893 = vmatpush1.bf16.msra.mxu0 %v1255_v0  ;;  %v1322_v0 = vcombine.high %v318_v61, %v321_v62  ;;  %v283_v62 = vld [vmem:[#allocation7 + $0x1d8] sm:$0xff] }
  0x7a   :  { %894 = vmatprep.subr.bf16.mxu0 %v1262_v2  ;;  %v323_v2 = vld [vmem:[#allocation7 + $0x380] sm:$0xff] }
  0x7b   :  { %866 = vmatpush1.bf16.msra.mxu1 %v1295_v17  ;;  %v1326_v4 = vcombine.high %v323_v2, %v326_v3  ;;  %v1325_v7 = vcombine.low %v323_v2, %v326_v3  ;;  %v1333_v17 = vcombine.low %v330_v13, %v333_v14  ;;  %v289_v2 = vld [vmem:[#allocation7 + $0x218] sm:$0xff] }
  0x7c   :  { %867 = vmatprep.subr.bf16.mxu1 %v1302_v20  ;;  %v292_v3 = vld [vmem:[#allocation7 + $0x238] sm:$0xff] }
  0x7d   :  { %895 = vmatpush1.bf16.msra.mxu0 %v1261_v8  ;;  %v1328_v8 = vcombine.high %v324_v5, %v327_v6  ;;  %v1294_v5 = vcombine.high %v289_v2, %v292_v3  ;;  %v295_v6 = vld [vmem:[#allocation7 + $0x258] sm:$0xff] }
  0x7e   :  { %896 = vmatprep.subr.bf16.mxu0 %v1268_v10  ;;  %v329_v10 = vld [vmem:[#allocation7 + $0x3c0] sm:$0xff] }
  0x7f   :  { %868 = vmatpush1.bf16.msra.mxu1 %v1301_v25  ;;  %v1332_v12 = vcombine.high %v329_v10, %v332_v11  ;;  %v1331_v15 = vcombine.low %v329_v10, %v332_v11  ;;  %v102_v25 = vld [vmem:[%s1795_s2] sm:$0x3]  ;;  %v301_v10 = vld [vmem:[#allocation7 + $0x298] sm:$0xff] }
  0x80   :  { %869 = vmatprep.subr.bf16.mxu1 %v1308_v28  ;;  %v304_v11 = vld [vmem:[#allocation7 + $0x2b8] sm:$0xff] }
  0x81   :  { %897 = vmatpush1.bf16.msra.mxu0 %v1267_v16  ;;  %v1334_v16 = vcombine.high %v330_v13, %v333_v14  ;;  %v1306_v13 = vcombine.high %v301_v10, %v304_v11  ;;  %v307_v14 = vld [vmem:[#allocation7 + $0x2d8] sm:$0xff] }
  0x82   :  { %898 = vmatprep.subr.bf16.mxu0 %v1274_v18  ;;  %v241_v18 = vld [vmem:[#allocation7 + $0x18] sm:$0xff] }
  0x83   :  { %870 = vmatpush1.bf16.msra.mxu1 %v1307_v33  ;;  %v1246_v20 = vcombine.high %v241_v18, %v244_v19  ;;  %v1245_v21 = vcombine.low %v241_v18, %v244_v19  ;;  %v313_v18 = vld [vmem:[#allocation7 + $0x318] sm:$0xff] }
  0x84   :  { %871 = vmatprep.subr.bf16.mxu1 %v1314_v36  ;;  %v316_v19 = vld [vmem:[#allocation7 + $0x338] sm:$0xff] }
  0x85   :  { %899 = vmatpush1.bf16.msra.mxu0 %v1273_v24  ;;  %v106_v24 = vsub.s32 0, %v1727_v23 }
  0x86   :  { %900 = vmatprep.subr.bf16.mxu0 %v1280_v26  ;;  %v110_v26 = vsub.s32 1, %v1727_v23 }
  0x87   :  { %872 = vmatpush1.bf16.msra.mxu1 %v1313_v41  ;;  %v107_v27 = vrot.slane %v102_v25, %v106_v24  ;;  %v1252_v41 = vcombine.high %v247_v37, %v250_v38  ;;  %v1416_v38 = vld [vmem:[#allocation8 + $0x40] sm:$0xff]  }
  0x88   :  { %873 = vmatprep.subr.bf16.mxu1 %v1320_v43  ;;  %v111_v28 = vrot.slane %v102_v25, %v110_v26  ;;  %v256_v43 = vld [vmem:[#allocation7 + $0xb8] sm:$0xff] }
  0x89   :  { %901 = vmatpush1.bf16.msra.mxu0 %v1279_v32  ;;  %v322_v25 = vld [vmem:[#allocation7 + $0x378] sm:$0xff] }
  0x8a   :  { %902 = vmatprep.subr.bf16.mxu0 %v1286_v34 }
  0x8b   :  { %874 = vmatpush1.bf16.msra.mxu1 %v1319_v47  ;;  %v262_v47 = vld [vmem:[#allocation7 + $0xf8] sm:$0xff] }
  0x8c   :  { %875 = vmatprep.subr.bf16.mxu1 %v1326_v4 }
  0x8d   :  { %903 = vmatpush1.bf16.msra.mxu0 %v1285_v40 }
  0x8e   :  { %904 = vmatprep.subr.bf16.mxu0 %v1292_v42  ;;  %v253_v42 = vld [vmem:[#allocation7 + $0x98] sm:$0xff] }
  0x8f   :  { %876 = vmatpush1.bf16.msra.mxu1 %v1325_v7  ;;  %v1258_v45 = vcombine.high %v253_v42, %v256_v43  ;;  %v298_v7 = vld [vmem:[#allocation7 + $0x278] sm:$0xff] }
  0x90   :  { %877 = vmatprep.subr.bf16.mxu1 %v1332_v12  ;;  %v1299_v12 = vcombine.low %v295_v6, %v298_v7 }
  0x91   :  { %905 = vmatpush1.bf16.msra.mxu0 %v1291_v46  ;;  %v259_v46 = vld [vmem:[#allocation7 + $0xd8] sm:$0xff] }
  0x92   :  { %906 = vmatprep.subr.bf16.mxu0 %v1298_v48  ;;  %v1257_v48 = vcombine.low %v253_v42, %v256_v43  ;;  %v1264_v49 = vcombine.high %v259_v46, %v262_v47  ;;  %v1419_v42 = vld [vmem:[#allocation8 + $0x8] sm:$0xff]   ;;  %v1420_v43 = vld [vmem:[#allocation8 + $0x50] sm:$0xff]  }
  0x93   :  { %878 = vmatpush1.bf16.msra.mxu1 %v1331_v15  ;;  %v310_v15 = vld [vmem:[#allocation7 + $0x2f8] sm:$0xff] }
  0x94   :  { %929 = vmatprep.subr.bf16.mxu1 %v1246_v20  ;;  %v1311_v20 = vcombine.low %v307_v14, %v310_v15 }
  0x95   :  { %907 = vmatpush1.bf16.msra.mxu0 %v1297_v51  ;;  %v268_v51 = vld [vmem:[#allocation7 + $0x138] sm:$0xff] }
  0x96   :  { %908 = vmatprep.subr.bf16.mxu0 %v1304_v52  ;;  %v1263_v52 = vcombine.low %v259_v46, %v262_v47  ;;  %v1270_v53 = vcombine.high %v265_v50, %v268_v51  ;;  %v1423_v46 = vld [vmem:[#allocation8 + $0x18] sm:$0xff]   ;;  %v1424_v47 = vld [vmem:[#allocation8 + $0x60] sm:$0xff]  }
  0x99   :  { %909 = vmatpush1.bf16.msra.mxu0 %v1303_v55  ;;  %v274_v55 = vld [vmem:[#allocation7 + $0x178] sm:$0xff] }
  0x9a   :  { %910 = vmatprep.subr.bf16.mxu0 %v1310_v56  ;;  %v1269_v56 = vcombine.low %v265_v50, %v268_v51  ;;  %v1276_v57 = vcombine.high %v271_v54, %v274_v55  ;;  %v1428_v50 = vld [vmem:[#allocation8 + $0x70] sm:$0xff]  }
  0x9b   :  { %v1429_v51 = vld [vmem:[#allocation8 + $0x30] sm:$0xff]  }
  0x9d   :  { %911 = vmatpush1.bf16.msra.mxu0 %v1309_v59  ;;  %v280_v59 = vld [vmem:[#allocation7 + $0x1b8] sm:$0xff] }
  0x9e   :  { %912 = vmatprep.subr.bf16.mxu0 %v1316_v60  ;;  %v1275_v60 = vcombine.low %v271_v54, %v274_v55  ;;  %v1282_v61 = vcombine.high %v277_v58, %v280_v59  ;;  %v335_v54 = vld [vmem:[%s1797_s4] sm:$0xff]  ;;  %s1623_s4 = smov [#allocation11]  }
  0x9f   :  { %v340_v55 = vrot.slane %v335_v54, %v106_v24  ;;  %s1197_s22 = sshll.u32 %s1623_s4, 4  ;;  %s1198_s22 = int_to_ptr.vmem [resolvable:$true] %s1197_s22 }
  0xa0   :  { %s1536_s23 = scalar_lea.vmem %s1198_s22, 128  ;;  %p1541_p7 = scmp.lt.s32.totalorder %s1198_s22, %s1198_s22 }
  0xa1   :  { %913 = vmatpush1.bf16.msra.mxu0 %v1315_v63  ;;  %v286_v63 = vld [vmem:[#allocation7 + $0x1f8] sm:$0xff]  ;;  %p1537_p6 = scmp.ne.s32.totalorder %s1198_s22, %s1536_s23  ;;  %p1542_p8 = scmp.lt.s32.totalorder %s1536_s23, %s1536_s23 }
  0xa2   :  { %914 = vmatprep.subr.bf16.mxu0 %v1322_v0  ;;  %v1281_v0 = vcombine.low %v277_v58, %v280_v59  ;;  %v1287_v4 = vcombine.low %v283_v62, %v286_v63  ;;  %v351_v58 = vsub.s32 5, %v1727_v23 }
  0xa3   :  { %p1543_p9 = por %p1542_p8, %p1541_p7 }
  0xa5   :  { %915 = vmatpush1.bf16.msra.mxu0 %v1321_v1  ;;  %v1288_v1 = vcombine.high %v283_v62, %v286_v63  ;;  %p1544_p10 = pnand %p1543_p9, %p1537_p6 }
  0xa6   :  { %916 = vmatprep.subr.bf16.mxu0 %v1328_v8  ;;  %v1293_v8 = vcombine.low %v289_v2, %v292_v3  ;;  %v352_v2 = vrot.slane %v335_v54, %v351_v58 }
  0xa9   :  { %917 = vmatpush1.bf16.msra.mxu0 %v1327_v9  ;;  %v1300_v9 = vcombine.high %v295_v6, %v298_v7 }
  0xaa   :  { %918 = vmatprep.subr.bf16.mxu0 %v1334_v16  ;;  %v1305_v16 = vcombine.low %v301_v10, %v304_v11 }
  0xad   :  { %919 = vmatpush1.bf16.msra.mxu0 %v1333_v17  ;;  %v1312_v17 = vcombine.high %v307_v14, %v310_v15 }
  0xae   :  { %1356 = vmatprep.subr.bf16.mxu0 %v1416_v38 }
 0x143   :  { %v228_v29 = vpop.f32.mrb[0].mxu0 }
 0x144   :  { %v229_v30 = vadd.f32 %v228_v29, %v107_v27  ;;  %v230_v31 = vpop.f32.mrb[1].mxu0  ;;  %v1317_v27 = vcombine.low %v313_v18, %v316_v19  ;;  %v325_v29 = vld [vmem:[#allocation7 + $0x398] sm:$0xff] }
 0x145   :  { %v231_v32 = vadd.f32 %v230_v31, %v111_v28  ;;  %v232_v33 = vpop.f32.mrb[2].mxu0  ;;  %v1324_v28 = vcombine.high %v319_v22, %v322_v25  ;;  %v1323_v31 = vcombine.low %v319_v22, %v322_v25 }
 0x146   :  { %v235_v34 = vmax.f32 %v229_v30, 0.0  ;;  %v233_v35 = vpop.f32.mrb[3].mxu0  ;;  %v328_v30 = vld [vmem:[#allocation7 + $0x3b8] sm:$0xff] }
 0x147   :  { %v236_v36 = vmax.f32 %v231_v32, 0.0  ;;  %v1330_v32 = vcombine.high %v325_v29, %v328_v30  ;;  %v331_v33 = vld [vmem:[#allocation7 + $0x3d8] sm:$0xff]  ;;  %v1329_v35 = vcombine.low %v325_v29, %v328_v30 }
 0x148   :  { %v1738_v40 = vpack.c.bf16 %v235_v34, %v235_v34  ;;  %v334_v34 = vld [vmem:[#allocation7 + $0x3f8] sm:$0xff] }
 0x149   :  { %v238_v39 = vpack.c.bf16 %v236_v36, %v236_v36  ;;  %v1336_v36 = vcombine.high %v331_v33, %v334_v34  ;;  %v1335_v37 = vcombine.low %v331_v33, %v334_v34 }
 0x14b   :  { %879 = vmatprep.mubr.bf16.mxu1 %v238_v39  ;;  %920 = vmatprep.mubr.bf16.mxu0 %v238_v39 }
 0x14c   :  { %880 = vmatmul.mubr.bf16.vlgmr.msra.gmra.mrb[0].mxu1 %v1738_v40  ;;  %921 = vmatmul.mubr.bf16.vlgmr.msra.gmra.mrb[4].mxu0 %v1738_v40 }
 0x14d   :  { %930 = vmatpush1.bf16.msra.mxu1 %v1245_v21  ;;  %961 = vmatprep.mubr.bf16.mxu1 %v238_v39  ;;  %v1318_v21 = vcombine.high %v313_v18, %v316_v19  ;;  %v1417_v39 = vld [vmem:[#allocation8] sm:$0xff]   ;;  %v355_v19 = vsub.s32 6, %v1727_v23 }
 0x14e   :  { %931 = vmatprep.subr.bf16.mxu1 %v1252_v41  ;;  %v1418_v41 = vld [vmem:[#allocation8 + $0x48] sm:$0xff]   ;;  %1357 = vmatpush3.bf16.msra.mxu0 %v1417_v39 }
 0x14f   :  { %1358 = vmatprep.subr.bf16.mxu0 %v1418_v41 }
 0x151   :  { %932 = vmatpush1.bf16.msra.mxu1 %v1251_v44  ;;  %v1421_v44 = vld [vmem:[#allocation8 + $0x10] sm:$0xff]  }
 0x152   :  { %933 = vmatprep.subr.bf16.mxu1 %v1258_v45  ;;  %1359 = vmatpush3.bf16.msra.mxu0 %v1419_v42  ;;  %v1422_v45 = vld [vmem:[#allocation8 + $0x58] sm:$0xff]  }
 0x153   :  { %1360 = vmatprep.subr.bf16.mxu0 %v1420_v43 }
 0x155   :  { %934 = vmatpush1.bf16.msra.mxu1 %v1257_v48  ;;  %v1425_v48 = vld [vmem:[#allocation8 + $0x20] sm:$0xff]  }
 0x156   :  { %935 = vmatprep.subr.bf16.mxu1 %v1264_v49  ;;  %1361 = vmatpush3.bf16.msra.mxu0 %v1421_v44  ;;  %v1427_v49 = vld [vmem:[#allocation8 + $0x28] sm:$0xff]  }
 0x157   :  { %1362 = vmatprep.subr.bf16.mxu0 %v1422_v45 }
 0x159   :  { %936 = vmatpush1.bf16.msra.mxu1 %v1263_v52  ;;  %v1430_v52 = vld [vmem:[#allocation8 + $0x78] sm:$0xff]  }
 0x15a   :  { %937 = vmatprep.subr.bf16.mxu1 %v1270_v53  ;;  %1363 = vmatpush3.bf16.msra.mxu0 %v1423_v46  ;;  %v1431_v53 = vld [vmem:[#allocation8 + $0x38] sm:$0xff]  }
 0x15b   :  { %1364 = vmatprep.subr.bf16.mxu0 %v1424_v47 }
 0x15d   :  { %938 = vmatpush1.bf16.msra.mxu1 %v1269_v56  ;;  %v347_v56 = vsub.s32 4, %v1727_v23 }
 0x15e   :  { %939 = vmatprep.subr.bf16.mxu1 %v1276_v57  ;;  %1365 = vmatpush3.bf16.msra.mxu0 %v1425_v48  ;;  %v344_v57 = vrot.slane %v335_v54, %v110_v26 }
 0x15f   :  { %v348_v62 = vrot.slane %v335_v54, %v347_v56 }
 0x161   :  { %940 = vmatpush1.bf16.msra.mxu1 %v1275_v60 }
 0x162   :  { %941 = vmatprep.subr.bf16.mxu1 %v1282_v61 }
 0x165   :  { %942 = vmatpush1.bf16.msra.mxu1 %v1281_v0 }
 0x166   :  { %943 = vmatprep.subr.bf16.mxu1 %v1288_v1 }
 0x169   :  { %944 = vmatpush1.bf16.msra.mxu1 %v1287_v4 }
 0x16a   :  { %945 = vmatprep.subr.bf16.mxu1 %v1294_v5 }
 0x16d   :  { %946 = vmatpush1.bf16.msra.mxu1 %v1293_v8 }
 0x16e   :  { %947 = vmatprep.subr.bf16.mxu1 %v1300_v9 }
 0x171   :  { %948 = vmatpush1.bf16.msra.mxu1 %v1299_v12 }
 0x172   :  { %949 = vmatprep.subr.bf16.mxu1 %v1306_v13 }
 0x175   :  { %950 = vmatpush1.bf16.msra.mxu1 %v1305_v16 }
 0x176   :  { %951 = vmatprep.subr.bf16.mxu1 %v1312_v17 }
 0x179   :  { %952 = vmatpush1.bf16.msra.mxu1 %v1311_v20  ;;  %v359_v20 = vsub.s32 7, %v1727_v23 }
 0x17a   :  { %953 = vmatprep.subr.bf16.mxu1 %v1318_v21  ;;  %v356_v21 = vrot.slane %v335_v54, %v355_v19 }
 0x17b   :  { %v360_v22 = vrot.slane %v335_v54, %v359_v20 }
 0x17d   :  { %954 = vmatpush1.bf16.msra.mxu1 %v1317_v27 }
 0x17e   :  { %955 = vmatprep.subr.bf16.mxu1 %v1324_v28 }
 0x181   :  { %956 = vmatpush1.bf16.msra.mxu1 %v1323_v31 }
 0x182   :  { %957 = vmatprep.subr.bf16.mxu1 %v1330_v32 }
 0x185   :  { %958 = vmatpush1.bf16.msra.mxu1 %v1329_v35 }
 0x186   :  { %959 = vmatprep.subr.bf16.mxu1 %v1336_v36 }
 0x189   :  { %960 = vmatpush1.bf16.msra.mxu1 %v1335_v37 }
 0x18c   :  { %962 = vmatmul.mubr.bf16.vlgmr.msra.gmra.mrb[4].mxu1 %v1738_v40  ;;  %v1426_v40 = vld [vmem:[#allocation8 + $0x68] sm:$0xff]  }
 0x18d   :  { %1366 = vmatprep.subr.bf16.mxu0 %v1426_v40 }
 0x18e   :  { %1367 = vmatpush3.bf16.msra.mxu0 %v1427_v49 }
 0x18f   :  { %1368 = vmatprep.subr.bf16.mxu0 %v1428_v50 }
 0x192   :  { %1369 = vmatpush3.bf16.msra.mxu0 %v1429_v51 }
 0x193   :  { %1370 = vmatprep.subr.bf16.mxu0 %v1430_v52 }
 0x196   :  { %1371 = vmatpush3.bf16.msra.mxu0 %v1431_v53 }
 0x21f   :  { %v881_v59 = vpop.f32.mrb[0].mxu1  ;;  %v922_v60 = vpop.f32.mrb[4].mxu0 }
 0x220   :  { %v882_v61 = vadd.f32 %v881_v59, %v340_v55  ;;  %v883_v63 = vpop.f32.mrb[1].mxu1  ;;  %v924_v0 = vpop.f32.mrb[5].mxu0  ;;  %v923_v8 = vadd.f32 %v922_v60, %v348_v62 }
 0x221   :  { %v884_v1 = vadd.f32 %v883_v63, %v344_v57  ;;  %v885_v3 = vpop.f32.mrb[2].mxu1  ;;  %v926_v4 = vpop.f32.mrb[6].mxu0  ;;  %v925_v26 = vadd.f32 %v924_v0, %v352_v2 }
 0x222   :  { %v970_v5 = vmul.f32 0.5, %v882_v61  ;;  %v886_v6 = vpop.f32.mrb[3].mxu1  ;;  %v927_v24 = vpop.f32.mrb[7].mxu0 }
 0x223   :  { %v971_v7 = vmul.f32 0.5, %v884_v1 }
 0x224   :  { %1432 = vtanh.f32 %v970_v5 }
 0x225   :  { %1434 = vtanh.f32 %v971_v7 }
 0x226   :  { %1436 = vtanh.f32 %v923_v8 }
 0x227   :  { %1438 = vtanh.f32 %v925_v26 }
 0x22e   :  { %v1433_v9 = vpop.eup %1432 }
 0x22f   :  { %v1435_v10 = vpop.eup %1434  ;;  %v974_v11 = vmul.f32 0.5, %v1433_v9 }
 0x230   :  { %v975_v12 = vmul.f32 0.5, %v1435_v10  ;;  %v1437_v14 = vpop.eup %1436 }
 0x231   :  { %v976_v13 = vadd.f32 0.5, %v974_v11  ;;  %v1439_v16 = vpop.eup %1438 }
 0x232   :  { %v977_v15 = vadd.f32 0.5, %v975_v12 }
 0x233   :  { %v988_v17 = vmul.f32 %v1437_v14, %v976_v13 }
 0x234   :  { %v989_v18 = vmul.f32 %v1439_v16, %v977_v15 }
 0x235   :  { %1179 = vst [vmem:[#allocation13] sm:$0xff] %v988_v17 }
 0x236   :  { %1180 = vst [vmem:[#allocation13 + $0x8] sm:$0xff] %v989_v18 }
 0x25f   :  { %v963_v25 = vpop.f32.mrb[4].mxu1 }
 0x260   :  { %v964_v27 = vadd.f32 %v963_v25, %v356_v21  ;;  %v965_v28 = vpop.f32.mrb[5].mxu1 }
 0x261   :  { %v966_v29 = vadd.f32 %v965_v28, %v360_v22  ;;  %v967_v30 = vpop.f32.mrb[6].mxu1 }
 0x262   :  { %v980_v31 = vmul.f32 0.5, %v964_v27  ;;  %v968_v32 = vpop.f32.mrb[7].mxu1 }
 0x263   :  { %v981_v33 = vmul.f32 0.5, %v966_v29 }
 0x264   :  { %1440 = vtanh.f32 %v980_v31 }
 0x265   :  { %1442 = vtanh.f32 %v981_v33 }
 0x266   :  { %1444 = vtanh.f32 %v988_v17 }
 0x267   :  { %1446 = vtanh.f32 %v989_v18 }
 0x26e   :  { %v1441_v34 = vpop.eup %1440 }
 0x26f   :  { %v1443_v35 = vpop.eup %1442  ;;  %v984_v36 = vmul.f32 0.5, %v1441_v34 }
 0x270   :  { %v985_v37 = vmul.f32 0.5, %v1443_v35  ;;  %v1445_v23 = vpop.eup %1444 }
 0x271   :  { %v986_v38 = vadd.f32 0.5, %v984_v36  ;;  %v1447_v41 = vpop.eup %1446 }
 0x272   :  { %v987_v39 = vadd.f32 0.5, %v985_v37 }
 0x273   :  { %v992_v42 = vmul.f32 %v1445_v23, %v986_v38 }
 0x274   :  { %v993_v43 = vmul.f32 %v1447_v41, %v987_v39 }
 0x275   :  { %v994_v46 = vpack.c.bf16 %v992_v42, %v992_v42 }
 0x276   :  { %v995_v44 = vpack.c.bf16 %v993_v43, %v993_v43  ;;  %v1355_v45 = vpack.c.bf16 %v993_v43, %v992_v42 }
 0x278   :  { %1163 = vmatprep.mubr.bf16.mxu0 %v995_v44  ;;  %1178 = vst [vmem:[#allocation11] sm:$0xff] %v1355_v45 }
 0x279   :  { %1164 = vmatmul.mubr.bf16.vlgmr.msra.gmra.mrb[8].mxu0 %v994_v46 }
 0x27a   :  { %1547 = shalt.err (!%p1544_p10)
}
 0x27b   :  { %s1548_s24 = scalar_lea.hbm %s1801_s8, 128 }
 0x27c   :  { %p1549_p11 = scmp.ne.s32.totalorder %s1801_s8, %s1548_s24  ;;  %p1552_p12 = scmp.lt.u32.totalorder %s1548_s24, %s1801_s8 }
 0x27e   :  { %p1554_p13 = pnand %p1552_p12, %p1549_p11 }
 0x280   :  { %1557 = shalt.err (!%p1554_p13)
}
 0x281   :  { %1200 = dma.vmem_to_hbm [thread:$0]  %s1198_s22, 128, %s1801_s8, [#allocation12]  }
 0x282   :  { %s1624_s13 = smov [#allocation13]  }
 0x283   :  { %s1207_s1 = sshll.u32 %s1624_s13, 4  ;;  %s1208_s1 = int_to_ptr.vmem [resolvable:$true] %s1207_s1 }
 0x284   :  { %s1558_s10 = scalar_lea.vmem %s1208_s1, 256  ;;  %p1563_p1 = scmp.lt.s32.totalorder %s1208_s1, %s1208_s1 }
 0x285   :  { %p1559_p0 = scmp.ne.s32.totalorder %s1208_s1, %s1558_s10  ;;  %p1564_p2 = scmp.lt.s32.totalorder %s1558_s10, %s1558_s10 }
 0x287   :  { %p1565_p3 = por %p1564_p2, %p1563_p1 }
 0x289   :  { %p1566_p4 = pnand %p1565_p3, %p1559_p0 }
 0x28b   :  { %1569 = shalt.err (!%p1566_p4)
}
 0x28c   :  { %s1570_s16 = scalar_lea.hbm %s1802_s9, 256 }
 0x28d   :  { %p1571_p5 = scmp.ne.s32.totalorder %s1802_s9, %s1570_s16  ;;  %p1574_p6 = scmp.lt.u32.totalorder %s1570_s16, %s1802_s9 }
 0x28f   :  { %p1576_p7 = pnand %p1574_p6, %p1571_p5 }
 0x291   :  { %1579 = shalt.err (!%p1576_p7)
}
 0x292   :  { %1210 = dma.vmem_to_hbm [thread:$0]  %s1208_s1, 256, %s1802_s9, [#allocation12]   ;;  %v1337_v48 = vld [vmem:[%s1799_s6] ss:$0 sm:$0xff] }
 0x293   :  { %s1625_s2 = smov [#allocation10]  }
 0x294   :  { %s1187_s21 = sshll.u32 %s1625_s2, 4  ;;  %s1188_s21 = int_to_ptr.vmem [resolvable:$true] %s1187_s21 }
 0x295   :  { %s1580_s4 = scalar_lea.vmem %s1188_s21, 128  ;;  %p1585_p9 = scmp.lt.s32.totalorder %s1188_s21, %s1188_s21 }
 0x296   :  { %p1581_p8 = scmp.ne.s32.totalorder %s1188_s21, %s1580_s4  ;;  %p1586_p10 = scmp.lt.s32.totalorder %s1580_s4, %s1580_s4 }
 0x298   :  { %p1587_p11 = por %p1586_p10, %p1585_p9 }
 0x29a   :  { %p1588_p12 = pnand %p1587_p11, %p1581_p8 }
 0x34c   :  { %v1372_v47 = vpop.f32.mrb[8].mxu0 }
 0x34d   :  { %v1373_v40 = vpop.f32.mrb[9].mxu0 }
 0x34e   :  { %v1374_v49 = vadd.f32 %v1373_v40, %v1372_v47  ;;  %v1375_v50 = vpop.f32.mrb[10].mxu0 }
 0x34f   :  { %v1376_v51 = vpop.f32.mrb[11].mxu0 }
 0x350   :  { %v1166_v52 = vadd.f32 %v1374_v49, %v1337_v48 }
 0x352   :  { %1171 = vst [vmem:[#allocation10] sm:$0xff] %v1166_v52 }
 0x353   :  { %1591 = shalt.err (!%p1588_p12)
}
 0x354   :  { %s1592_s6 = scalar_lea.hbm %s1800_s7, 128 }
 0x355   :  { %p1593_p13 = scmp.ne.s32.totalorder %s1800_s7, %s1592_s6  ;;  %p1596_p0 = scmp.lt.u32.totalorder %s1592_s6, %s1800_s7 }
 0x357   :  { %p1598_p1 = pnand %p1596_p0, %p1593_p13 }
 0x359   :  { %1601 = shalt.err (!%p1598_p1)
}
 0x35a   :  { %1190 = dma.vmem_to_hbm [thread:$0]  %s1188_s21, 128, %s1800_s7, [#allocation4]  }
 0x35b   :  { %1608 = dma.done.wait [#allocation4], 128  }
 0x35c   :  { %1609 = vsyncadd [#allocation4], 4294967168 }
 0x35d   :  { %1610 = dma.done.wait [#allocation12], 384  }
 0x35e   :  { %1611 = vsyncadd [#allocation12], 4294966912 }
 0x35f   :  { %1220 = vsyncpa [#allocation3], 1 }
 0x360   :  { %1221 = vsyncpa [#allocation6], 1 }
 0x361   :  { %1222 = vsyncpa [#allocation9], 1 }
 0x362   :  { %1223 = vsyncpa [#allocation4], 1 }
 0x363   :  { %1224 = vsyncpa [#allocation12], 1 }

</bundles_post_ra>
